<compile_context>
chip_gen: v5e
topology: v5e:2x2
jax: 0.10.0
libtpu: 0.0.40
codegen_flags: <defaults>
</compile_context>

<pallas_src>
import numpy as np
import jax
import jax.numpy as jnp
from jax.experimental import pallas as pl
from jax.experimental.pallas import tpu as pltpu


def _threshold_kernel(x_ref, o_ref):
    v = x_ref[...]
    # torch.where(pred_vol > 0, pred_vol, 0): NaN -> 0 (jnp.maximum would propagate NaN).
    o_ref[...] = jnp.where(v > 0.0, v, 0.0)


def _target_block_bytes():
    """~4 MiB blocks on v6e/v7x (32 MiB scoped-VMEM default), ~2 MiB on v5e (16 MiB default)."""
    try:
        kind = jax.devices()[0].device_kind.lower()
    except Exception:
        return 2 << 20
    if "v5 lite" in kind or "v5e" in kind or "v5litepod" in kind:
        return 2 << 20
    return 4 << 20


def _build_threshold_call(in_shape):
    """Single-pass threshold over a volume whose last three dims are (D, H, W).

    The jitted function takes an array of shape `in_shape` (leading dims all singleton) and
    returns the thresholded volume in the SAME shape/dtype so the donated input buffer can be
    aliased to the output.
    """
    D, H, W = (int(s) for s in in_shape[-3:])
    itemsize = 4
    # Lane-dense 2-D view via a contiguous-dim merge (a bitcast under jit, no HBM traffic).
    if H * W * itemsize * 8 <= (8 << 20):   # 8 planes fit comfortably in a VMEM block
        rows, cols = D, H * W                # lane-dense when H*W >= 128 (typical)
    else:                                    # very large planes: merge the leading dims instead
        rows, cols = D * H, W

    target = _target_block_bytes()
    block_rows = max(1, min(rows, target // max(cols * itemsize, 1)))
    # Guarantee >= 2 grid steps for large volumes so "parallel" shards across both v7x TCs.
    total_bytes = rows * cols * itemsize
    if total_bytes > (8 << 20) and block_rows >= rows and rows >= 2:
        block_rows = (rows + 1) // 2
    # (8,128) rule: second-to-last block dim must be a multiple of 8 or equal the full dim.
    if block_rows < rows:
        block_rows = max(8, (block_rows // 8) * 8)
        if block_rows >= rows:
            block_rows = rows

    grid = (pl.cdiv(rows, block_rows),)
    spec = pl.BlockSpec((block_rows, cols), lambda i: (i, 0))

    call = pl.pallas_call(
        _threshold_kernel,
        out_shape=jax.ShapeDtypeStruct((rows, cols), jnp.float32),
        grid=grid,
        in_specs=[spec],
        out_specs=spec,
        input_output_aliases={0: 0},
        compiler_params=pltpu.CompilerParams(dimension_semantics=("parallel",)),
    )

    def run(x):
        # Reshapes below are contiguous-dim merges/splits -> bitcasts, fused away by XLA.
        return call(x.reshape(rows, cols)).reshape(x.shape)

    return jax.jit(run, donate_argnums=(0,))


class PostprocessV0:
    """JAX/Pallas port of Postprocess_v0."""

    def __init__(self, setup_params, small_volume_bypass_elems=262144):
        self.psize_xy = 1.0 / setup_params['upsampling_factor']
        self.psize_z = setup_params['pixel_size_axial']
        self.zmin = setup_params['zmin']
        # Volumes at or below this many elements are launch/transfer dominated; threshold on
        # host instead of dispatching a TPU kernel.
        self.small_volume_bypass_elems = small_volume_bypass_elems
        self._call_cache = {}

    def _get_call(self, shape):
        key = tuple(int(s) for s in shape)
        if key not in self._call_cache:
            self._call_cache[key] = _build_threshold_call(key)
        return self._call_cache[key]

    def __call__(self, pred_vol):
        conf = jnp.asarray(pred_vol, jnp.float32)
        if conf.ndim < 3:
            raise ValueError(f"pred_vol must have >= 3 dims, got shape {conf.shape}")
        # The torch forward squeezes back to the 3-D confidence volume.  Only require the
        # leading (batch/channel) dims to be singleton so a volume with D/H/W == 1 is not
        # over-squeezed.
        lead = 1
        for s in conf.shape[:-3]:
            lead *= int(s)
        if lead != 1:
            raise ValueError(f"expected singleton batch/channel dims, got shape {conf.shape}")
        D, H, W = (int(s) for s in conf.shape[-3:])
        n = D * H * W

        if n <= self.small_volume_bypass_elems:
            # Host bypass: one D2H transfer, same semantics (NaN -> 0).
            c = np.asarray(conf).reshape(D, H, W)
            thr_np = np.where(c > 0.0, c, 0.0).astype(np.float32)
        else:
            run = self._get_call(conf.shape)
            thr = run(conf)                    # NOTE: donates conf's device buffer (aliased out)
            jax.block_until_ready(thr)
            thr_np = np.asarray(thr).reshape(D, H, W)   # single D2H; numpy reshape is free

        zb, yb, xb = np.nonzero(thr_np)
        if len(zb) == 0:
            return None, None, None

        # Sub-pixel coordinates reconstructed from indices on host (identical to torch module).
        xrec = (xb - np.floor(W / 2) + 0.5) * self.psize_xy
        yrec = (yb - np.floor(H / 2) + 0.5) * self.psize_xy
        zrec = (zb + 0.5) * self.psize_z + self.zmin

        xyz_rec = np.column_stack((xrec, yrec, zrec))
        xyz_bool = np.column_stack((xb, yb, zb))
        conf_rec = np.squeeze(thr_np[zb, yb, xb])
        return xyz_rec, conf_rec, xyz_bool


def _numpy_reference(pred_vol, psize_xy, psize_z, zmin):
    conf = np.asarray(pred_vol, np.float32)
    D, H, W = conf.shape[-3:]
    conf = conf.reshape(D, H, W)
    conf = np.where(conf > 0.0, conf, 0.0)
    zb, yb, xb = np.nonzero(conf)
    if len(zb) == 0:
        return None, None, None
    xrec = (xb - np.floor(W / 2) + 0.5) * psize_xy
    yrec = (yb - np.floor(H / 2) + 0.5) * psize_xy
    zrec = (zb + 0.5) * psize_z + zmin
    xyz_rec = np.column_stack((xrec, yrec, zrec))
    xyz_bool = np.column_stack((xb, yb, zb))
    conf_rec = np.squeeze(conf[zb, yb, xb])
    return xyz_rec, conf_rec, xyz_bool


if __name__ == "__main__":
    setup_params = {
        'device': None,
        'upsampling_factor': 4,      # -> psize_xy = 0.25
        'pixel_size_axial': 0.1,     # -> psize_z
        'zmin': -1.0,
    }
    # bypass threshold 0 -> always exercise the Pallas kernel even for these small test volumes.
    pp_pallas = PostprocessV0(setup_params, small_volume_bypass_elems=0)
    pp_bypass = PostprocessV0(setup_params)   # default: tiny volumes take the host bypass

    key = jax.random.PRNGKey(0)
    test_shapes = [
        (1, 1, 4, 16, 16),    # 5-D torch-style input
        (1, 1, 8, 32, 128),   # lane-dense planes
        (8, 32, 128),         # bare 3-D volume
    ]

    for shape in test_shapes:
        key, sub = jax.random.split(key)
        pred_np = np.asarray(jax.random.normal(sub, shape, dtype=jnp.float32))

        ref_xyz, ref_conf, ref_bool = _numpy_reference(
            pred_np, pp_pallas.psize_xy, pp_pallas.psize_z, pp_pallas.zmin)

        for pp in (pp_pallas, pp_bypass):
            xyz_rec, conf_rec, xyz_bool = pp(pred_np)
            assert (xyz_rec is None) == (ref_xyz is None)
            if xyz_rec is not None:
                np.testing.assert_allclose(xyz_rec, ref_xyz, rtol=1e-6, atol=1e-6)
                np.testing.assert_allclose(conf_rec, ref_conf, rtol=1e-6, atol=1e-6)
                np.testing.assert_array_equal(xyz_bool, ref_bool)

    # All-negative volume -> (None, None, None), via the Pallas path.
    key, sub = jax.random.split(key)
    neg = -np.abs(np.asarray(jax.random.normal(sub, (1, 1, 4, 16, 16), dtype=jnp.float32))) - 1.0
    out = pp_pallas(neg.astype(np.float32))
    assert out == (None, None, None)

    print("KERNEL_OK")
</pallas_src>

<mosaic_0001>
module attributes {stable_mosaic.version = 11 : i64} {
  func.func @_threshold_kernel(%arg0: i32, %arg1: memref<4x256xf32, #tpu.memory_space<vmem>>, %arg2: memref<4x256xf32, #tpu.memory_space<vmem>>) attributes {dimension_semantics = [#tpu.dimension_semantics<parallel>], iteration_bounds = array<i64: 1>, scalar_prefetch = 0 : i64, scratch_operands = 0 : i64, tpu.core_type = #tpu.core_type<tc>, window_params = [{transform_indices = @transform_0, window_bounds = array<i64: 4, 256>}, {transform_indices = @transform_1, window_bounds = array<i64: 4, 256>}]} {
    %c0 = arith.constant 0 : index
    %c0_0 = arith.constant 0 : index
    %0 = vector.load %arg1[%c0, %c0_0] : memref<4x256xf32, #tpu.memory_space<vmem>>, vector<4x256xf32>
    %cst = arith.constant 0.000000e+00 : f32
    %1 = vector.broadcast %cst : f32 to vector<4x256xf32>
    %2 = arith.cmpf ogt, %0, %1 : vector<4x256xf32>
    %cst_1 = arith.constant 0.000000e+00 : f32
    %3 = vector.broadcast %cst_1 : f32 to vector<4x256xf32>
    %4 = arith.select %2, %0, %3 : vector<4x256xi1>, vector<4x256xf32>
    %c0_2 = arith.constant 0 : index
    %c0_3 = arith.constant 0 : index
    %5 = vector.load %arg2[%c0_2, %c0_3] : memref<4x256xf32, #tpu.memory_space<vmem>>, vector<4x256xf32>
    tpu.vector_store %arg2[%c0_2, %c0_3], %4 {strides = array<i32>} : memref<4x256xf32, #tpu.memory_space<vmem>>, vector<4x256xf32>,
    return
  }
  func.func @transform_0(%arg0: i32) -> (i32, i32) {
    %c0_i32 = arith.constant 0 : i32
    %c0_i32_0 = arith.constant 0 : i32
    return %arg0, %c0_i32 : i32, i32
  }
  func.func @transform_1(%arg0: i32) -> (i32, i32) {
    %c0_i32 = arith.constant 0 : i32
    %c0_i32_0 = arith.constant 0 : i32
    return %arg0, %c0_i32 : i32, i32
  }
}

</mosaic_0001>

<bundles_post_ra>
// kernel: run.1
= control target key start
LH: loop header
LB: loop body
LE: loop exit
PB: predicated region body
PF: predicated region fallthrough
CT: control target
= control target key end

     0   :  { %s32_s0 = inlined_call_operand.vmem [shape: f32[4,256], index: 0, kind: input, shape index: {}, may-alias: {0,1}]   ;;  %s33_s1 = inlined_call_operand.vmem [shape: f32[4,256], index: 1, kind: output, shape index: {}, may-alias: {0,1}]  }
   0x1   :  { %v8_v0 = vld [vmem:[%s32_s0] sm:$0xff] }
   0x2   :  { %vm9_vm0 = vcmp.gt.f32.partialorder %v8_v0, 0.0 }
   0x3   :  { %v10_v1 = vsel %vm9_vm0, %v8_v0, 0.0 }
   0x4   :  { %11 = vst [vmem:[%s33_s1] sm:$0xff] %v10_v1 }

</bundles_post_ra>
